<compile_context>
chip_gen: v6e
topology: v6e:2x2x1
jax: 0.10.0
libtpu: 0.0.40
codegen_flags: <defaults>
</compile_context>

<pallas_src>
import functools

import numpy as np
import jax
import jax.numpy as jnp
from jax.experimental import pallas as pl
from jax.experimental.pallas import tpu as pltpu


def _gemhpp_kernel(p_ref, x_ref, pool_ref, o_ref, *, eps):
    # p_ref:    SMEM scalar parameter, shape (1,)
    # x_ref:    VMEM tile [tile_n, HW]           (lane-dense input block)
    # pool_ref: VMEM      [HW, sum(bin_num)]     (block-diagonal 1/S_b matrix)
    # o_ref:    VMEM tile [tile_n, sum(bin_num)] (all bins, already concatenated)
    p = p_ref[0]
    x = jnp.maximum(x_ref[...].astype(jnp.float32), eps)   # clamp(min=eps)
    z = jnp.power(x, p)                                     # x^p (x > 0, safe)
    # Per-bin mean over each contiguous segment of the HW axis, for every bin
    # size at once, via one MXU matmul (reduction stays on the lane axis).
    m = jnp.dot(z, pool_ref[...], preferred_element_type=jnp.float32)
    o_ref[...] = jnp.power(m, 1.0 / p).astype(o_ref.dtype)  # ^(1/p)


def _build_pool_matrix(hw, bin_num):
    """[hw, sum(bin_num)] block-diagonal averaging matrix.

    Column (bin b, slot k) has 1/S_b at rows j with j // S_b == k, matching
    x.view(n, c, b, -1) followed by a mean over the last axis.
    """
    cols = []
    for b in bin_num:
        s = hw // b
        block = (np.arange(hw)[:, None] // s == np.arange(b)[None, :])
        cols.append(block.astype(np.float32) / float(s))
    return jnp.asarray(np.concatenate(cols, axis=1))


def _choose_tile_n(n_rows, hw, itemsize, target_block_bytes):
    """Rows per block: ~target_block_bytes of input, multiple of 8 (or full N)."""
    rows = max(1, target_block_bytes // max(1, hw * itemsize))
    if rows >= n_rows:
        return n_rows                      # full array in one block
    rows = max(8, (rows // 8) * 8)         # sublane-aligned
    return min(rows, n_rows)


def gemhpp_forward(x, p, bin_num=(32,), eps=1e-6, target_block_bytes=4 << 20):
    """x: [n, c, h, w] (NCHW) -> [n, c, sum(bin_num)]."""
    n, c, h, w = x.shape
    hw = h * w
    for b in bin_num:
        assert hw % b == 0, "h*w must be divisible by each bin count"

    N = n * c
    x_flat = x.reshape(N, hw)                       # lane axis = h*w
    pool = _build_pool_matrix(hw, bin_num)          # [hw, P_total], f32
    p_total = pool.shape[1]

    tile_n = _choose_tile_n(N, hw, x_flat.dtype.itemsize, target_block_bytes)
    grid = (pl.cdiv(N, tile_n),)

    # VMEM budget: double-buffered input block + pool matrix + output block
    # + elementwise intermediate, with headroom; capped for v7x's 64 MiB VMEM.
    in_blk = tile_n * hw * 4
    pool_b = hw * p_total * 4
    out_blk = tile_n * p_total * 4
    vmem_need = 4 * in_blk + 2 * pool_b + 2 * out_blk + (4 << 20)
    vmem_limit = int(min(max(vmem_need, 16 << 20), 48 << 20))

    out = pl.pallas_call(
        functools.partial(_gemhpp_kernel, eps=eps),
        out_shape=jax.ShapeDtypeStruct((N, p_total), jnp.float32),
        grid=grid,
        in_specs=[
            pl.BlockSpec(memory_space=pltpu.MemorySpace.SMEM),        # p (scalar)
            pl.BlockSpec((tile_n, hw), lambda i: (i, 0)),             # x block
            pl.BlockSpec((hw, p_total), lambda i: (0, 0)),            # pool matrix
        ],
        out_specs=pl.BlockSpec((tile_n, p_total), lambda i: (i, 0)),
        compiler_params=pltpu.CompilerParams(
            dimension_semantics=("parallel",),
            vmem_limit_bytes=vmem_limit,
        ),
    )(p, x_flat, pool)

    return out.reshape(n, c, p_total)


def gemhpp_reference(x, p, bin_num=(32,), eps=1e-6):
    """Pure-JAX reference mirroring the PyTorch forward."""
    n, c, h, w = x.shape
    pv = p[0]
    feats = []
    for b in bin_num:
        z = x.reshape(n, c, b, -1)
        z = jnp.power(
            jnp.mean(jnp.power(jnp.maximum(z, eps), pv), axis=-1), 1.0 / pv)
        feats.append(z)
    return jnp.concatenate(feats, axis=-1)


if __name__ == "__main__":
    # Deterministic parameter init, mirroring nn.Parameter(torch.ones(1) * 6.5)
    p_param = jnp.ones((1,), dtype=jnp.float32) * 6.5
    bin_num = (32,)
    eps = 1e-6

    # Small NCHW input consistent with the module (h*w divisible by 32).
    key = jax.random.PRNGKey(0)
    n, c, h, w = 2, 4, 16, 16
    x = jax.random.normal(key, (n, c, h, w), dtype=jnp.float32)

    out = gemhpp_forward(x, p_param, bin_num=bin_num, eps=eps)
    out = jax.block_until_ready(out)

    ref = gemhpp_reference(x, p_param, bin_num=bin_num, eps=eps)
    assert out.shape == (n, c, sum(bin_num)), out.shape
    assert jnp.allclose(out, ref, rtol=1e-5, atol=1e-5), "mismatch vs reference"

    print("KERNEL_OK")
</pallas_src>

<mosaic_0001>
module attributes {stable_mosaic.version = 11 : i64} {
  func.func @_gemhpp_kernel(%arg0: i32, %arg1: memref<1xf32, #tpu.memory_space<smem>>, %arg2: memref<8x256xf32, #tpu.memory_space<vmem>>, %arg3: memref<256x32xf32, #tpu.memory_space<vmem>>, %arg4: memref<8x32xf32, #tpu.memory_space<vmem>>) attributes {dimension_semantics = [#tpu.dimension_semantics<parallel>], iteration_bounds = array<i64: 1>, scalar_prefetch = 0 : i64, scratch_operands = 0 : i64, tpu.core_type = #tpu.core_type<tc>, window_params = [{transform_indices = @transform_0, window_bounds = array<i64: 1>}, {transform_indices = @transform_1, window_bounds = array<i64: 8, 256>}, {pipeline_mode = #tpu.pipeline_mode<synchronous>, transform_indices = @transform_2, window_bounds = array<i64: 256, 32>}, {transform_indices = @transform_3, window_bounds = array<i64: 8, 32>}]} {
    %c0 = arith.constant 0 : index
    %0 = memref.load %arg1[%c0] : memref<1xf32, #tpu.memory_space<smem>>
    %c0_0 = arith.constant 0 : index
    %c0_1 = arith.constant 0 : index
    %1 = vector.load %arg2[%c0_0, %c0_1] : memref<8x256xf32, #tpu.memory_space<vmem>>, vector<8x256xf32>
    %cst = arith.constant 9.99999997E-7 : f32
    %2 = vector.broadcast %cst : f32 to vector<8x256xf32>
    %3 = arith.maximumf %1, %2 : vector<8x256xf32>
    %4 = vector.broadcast %0 : f32 to vector<8x256xf32>
    %5 = math.powf %3, %4 : vector<8x256xf32>
    %c0_2 = arith.constant 0 : index
    %c0_3 = arith.constant 0 : index
    %6 = vector.load %arg3[%c0_2, %c0_3] : memref<256x32xf32, #tpu.memory_space<vmem>>, vector<256x32xf32>
    %cst_4 = arith.constant dense<0.000000e+00> : vector<8x32xf32>
    %7 = tpu.matmul %5, %6, %cst_4 {dimension_numbers = #tpu.dot_dimension_numbers<[1], [0], [0], [1], [0, 0, 1, 1], [], []>} : vector<8x256xf32>, vector<256x32xf32>, vector<8x32xf32> -> vector<8x32xf32>
    %cst_5 = arith.constant 1.000000e+00 : f32
    %8 = arith.divf %cst_5, %0 : f32
    %9 = vector.broadcast %8 : f32 to vector<8x32xf32>
    %10 = math.powf %7, %9 : vector<8x32xf32>
    %c0_6 = arith.constant 0 : index
    %c0_7 = arith.constant 0 : index
    %11 = vector.load %arg4[%c0_6, %c0_7] : memref<8x32xf32, #tpu.memory_space<vmem>>, vector<8x32xf32>
    tpu.vector_store %arg4[%c0_6, %c0_7], %10 {strides = array<i32>} : memref<8x32xf32, #tpu.memory_space<vmem>>, vector<8x32xf32>,
    return
  }
  func.func @transform_0(%arg0: i32) -> i32 {
    %c0_i32 = arith.constant 0 : i32
    %c0_i32_0 = arith.constant 0 : i32
    return %c0_i32 : i32
  }
  func.func @transform_1(%arg0: i32) -> (i32, i32) {
    %c0_i32 = arith.constant 0 : i32
    %c0_i32_0 = arith.constant 0 : i32
    return %arg0, %c0_i32 : i32, i32
  }
  func.func @transform_2(%arg0: i32) -> (i32, i32) {
    %c0_i32 = arith.constant 0 : i32
    %c0_i32_0 = arith.constant 0 : i32
    %c0_i32_1 = arith.constant 0 : i32
    return %c0_i32, %c0_i32_0 : i32, i32
  }
  func.func @transform_3(%arg0: i32) -> (i32, i32) {
    %c0_i32 = arith.constant 0 : i32
    %c0_i32_0 = arith.constant 0 : i32
    return %arg0, %c0_i32 : i32, i32
  }
}

</mosaic_0001>

<bundles_post_ra>
// kernel: tpu_custom_call.1
= control target key start
LH: loop header
LB: loop body
LE: loop exit
PB: predicated region body
PF: predicated region fallthrough
CT: control target
= control target key end

     0   :  { %s698_s0 = inlined_call_operand.<no memory space> [shape: f32[1], index: 0, kind: input, shape index: {}]   ;;  %s699_s1 = inlined_call_operand.vmem [shape: f32[8,256], index: 1, kind: input, shape index: {}]   ;;  %s700_s2 = inlined_call_operand.vmem [shape: f32[256,32], index: 2, kind: input, shape index: {}]   ;;  %s701_s3 = inlined_call_operand.hbm [shape: f32[8,32], index: 3, kind: output, shape index: {}]  }
   0x1   :  { %v55_v0 = vld [vmem:[%s700_s2 + $0xf8] sm:$0xff]  ;;  %v54_v2 = vld [vmem:[%s700_s2 + $0xf0] sm:$0xff]  ;;  %v417_v4 = vstv %s698_s0  ;;  %v53_v5 = vld [vmem:[%s700_s2 + $0xe8] sm:$0xff] }
   0x2   :  { %v39_v1 = vld [vmem:[%s700_s2 + $0x78] sm:$0xff]  ;;  %147 = vmatprep.subr.mxu0 %v55_v0  ;;  %v38_v3 = vld [vmem:[%s700_s2 + $0x70] sm:$0xff]  ;;  %343 = vrcp.f32 %v417_v4  ;;  %v37_v6 = vld [vmem:[%s700_s2 + $0x68] sm:$0xff]  ;;  %v467_v21 = vand.u32 2147483647, %v417_v4  ;;  %v191_v31 = vtrunc.f32 %v417_v4 }
   0x3   :  { %148 = vmatpush3.msra.mxu0 %v39_v1  ;;  %v52_v7 = vld [vmem:[%s700_s2 + $0xe0] sm:$0xff]  ;;  %v51_v9 = vld [vmem:[%s700_s2 + $0xd8] sm:$0xff]  ;;  %v50_v11 = vld [vmem:[%s700_s2 + $0xd0] sm:$0xff] }
   0x4   :  { %149 = vmatprep.subr.mxu0 %v54_v2  ;;  %v36_v8 = vld [vmem:[%s700_s2 + $0x60] sm:$0xff]  ;;  %v35_v10 = vld [vmem:[%s700_s2 + $0x58] sm:$0xff]  ;;  %v34_v12 = vld [vmem:[%s700_s2 + $0x50] sm:$0xff]  ;;  %v195_v29 = vtrunc.f32 %v467_v21  ;;  %vm702_vm0 = vcmp.eq.f32.partialorder %v467_v21, 2139095040  ;;  %vm192_vm1 = vcmp.ne.f32.partialorder %v417_v4, %v191_v31 }
   0x5   :  { %150 = vmatpush3.msra.mxu0 %v38_v3  ;;  %v49_v13 = vld [vmem:[%s700_s2 + $0xc8] sm:$0xff]  ;;  %v17_v17 = vld [vmem:[%s699_s1] sm:$0xff]  ;;  %v47_v23 = vld [vmem:[%s700_s2 + $0xb8] sm:$0xff] }
   0x6   :  { %151 = vmatprep.subr.mxu0 %v53_v5  ;;  %v18_v14 = vld [vmem:[%s699_s1 + $0x8] sm:$0xff]  ;;  %v48_v18 = vld [vmem:[%s700_s2 + $0xc0] sm:$0xff]  ;;  %v461_v19 = vmax.f32 %v17_v17, 1e-06  ;;  %v31_v26 = vld [vmem:[%s700_s2 + $0x38] sm:$0xff]  ;;  %v196_v35 = vcvt.f32.s32 %v195_v29 }
   0x7   :  { %152 = vmatpush3.msra.mxu0 %v37_v6  ;;  %v33_v15 = vld [vmem:[%s700_s2 + $0x48] sm:$0xff]  ;;  %v453_v16 = vmax.f32 %v18_v14, 1e-06  ;;  %v32_v20 = vld [vmem:[%s700_s2 + $0x40] sm:$0xff]  ;;  %v46_v27 = vld [vmem:[%s700_s2 + $0xb0] sm:$0xff] }
   0x8   :  { %153 = vmatprep.subr.mxu0 %v52_v7  ;;  %v476_v24 = vand.u32 2147483647, %v461_v19  ;;  %v30_v28 = vld [vmem:[%s700_s2 + $0x30] sm:$0xff]  ;;  %v45_v30 = vld [vmem:[%s700_s2 + $0xa8] sm:$0xff]  ;;  %v44_v33 = vld [vmem:[%s700_s2 + $0xa0] sm:$0xff]  ;;  %v197_v41 = vand.u32 1, %v196_v35 }
   0x9   :  { %154 = vmatpush3.msra.mxu0 %v36_v8  ;;  %v470_v22 = vand.u32 2147483647, %v453_v16  ;;  %v29_v32 = vld [vmem:[%s700_s2 + $0x28] sm:$0xff]  ;;  %v28_v34 = vld [vmem:[%s700_s2 + $0x20] sm:$0xff]  ;;  %v43_v36 = vld [vmem:[%s700_s2 + $0x98] sm:$0xff] }
   0xa   :  { %155 = vmatprep.subr.mxu0 %v51_v9  ;;  %v27_v37 = vld [vmem:[%s700_s2 + $0x18] sm:$0xff]  ;;  %v42_v38 = vld [vmem:[%s700_s2 + $0x90] sm:$0xff]  ;;  %vm519_vm2 = vmor %vm192_vm1, %vm702_vm0  ;;  %vm198_vm4 = vcmp.eq.s32.totalorder %v197_v41, 1 }
   0xb   :  { %156 = vmatpush3.msra.mxu0 %v35_v10  ;;  %345 = vlog2.f32 %v470_v22  ;;  %v26_v39 = vld [vmem:[%s700_s2 + $0x10] sm:$0xff]  ;;  %v41_v42 = vld [vmem:[%s700_s2 + $0x88] sm:$0xff]  ;;  %v40_v45 = vld [vmem:[%s700_s2 + $0x80] sm:$0xff] }
   0xc   :  { %157 = vmatprep.subr.mxu0 %v50_v11  ;;  %347 = vlog2.f32 %v476_v24  ;;  %v25_v43 = vld [vmem:[%s700_s2 + $0x8] sm:$0xff]  ;;  %vm199_vm3 = vmneg %vm519_vm2  ;;  %v24_v47 = vld [vmem:[%s700_s2] sm:$0xff] }
   0xd   :  { %158 = vmatpush3.msra.mxu0 %v34_v12 }
   0xe   :  { %159 = vmatprep.subr.mxu0 %v49_v13 }
   0xf   :  { %160 = vmatpush3.msra.mxu0 %v33_v15  ;;  %v344_v25 = vpop.eup %343 }
  0x10   :  { %161 = vmatprep.subr.mxu0 %v48_v18  ;;  %286 = vpush %v344_v25 }
  0x11   :  { %162 = vmatpush3.msra.mxu0 %v32_v20 }
  0x12   :  { %163 = vmatprep.subr.mxu0 %v47_v23 }
  0x13   :  { %164 = vmatpush3.msra.mxu0 %v31_v26 }
  0x14   :  { %165 = vmatprep.subr.mxu0 %v46_v27 }
  0x15   :  { %166 = vmatpush3.msra.mxu0 %v30_v28 }
  0x16   :  { %167 = vmatprep.subr.mxu0 %v45_v30 }
  0x17   :  { %168 = vmatpush3.msra.mxu0 %v29_v32 }
  0x18   :  { %169 = vmatprep.subr.mxu0 %v44_v33  ;;  %v346_v44 = vpop.eup %345 }
  0x19   :  { %170 = vmatpush3.msra.mxu0 %v28_v34  ;;  %v348_v46 = vpop.eup %347  ;;  %v236_v48 = vmul.f32 %v346_v44, %v417_v4 }
  0x1a   :  { %171 = vmatprep.subr.mxu0 %v43_v36 }
  0x1b   :  { %172 = vmatpush3.msra.mxu0 %v27_v37 }
  0x1c   :  { %173 = vmatprep.subr.mxu0 %v42_v38 }
  0x1d   :  { %174 = vmatpush3.msra.mxu0 %v26_v39 }
  0x1e   :  { %175 = vmatprep.subr.mxu0 %v41_v42 }
  0x1f   :  { %9 = vsyncpa [#allocation4], 0  ;;  %176 = vmatpush3.msra.mxu0 %v25_v43  ;;  %v184_v49 = vmul.f32 %v348_v46, %v417_v4  ;;  %349 = vpow2.f32 %v236_v48  ;;  %vm194_vm5 = vcmp.lt.f32.partialorder %v467_v21, 1266679808  ;;  %vm190_vm7 = vcmp.lt.f32.partialorder %v417_v4, 0  ;;  %s381_s24 = smov [#allocation3]  }
  0x20   :  { %177 = vmatprep.subr.mxu0 %v40_v45  ;;  %vm200_vm6 = vmand %vm198_vm4, %vm199_vm3  ;;  %vm255_vm8 = vcmp.eq.f32.partialorder %v453_v16, 0  ;;  %vm258_vm9 = vcmp.gt.f32.partialorder %v470_v22, 1065353216  ;;  %vm203_vm11 = vcmp.eq.f32.partialorder %v461_v19, 0  ;;  %vm206_vm13 = vcmp.gt.f32.partialorder %v476_v24, 1065353216  ;;  %s139_s25 = sshll.u32 %s381_s24, 4  ;;  %s140_s25 = int_to_ptr.vmem [resolvable:$true] %s139_s25 }
  0x21   :  { %178 = vmatpush3.msra.mxu0 %v24_v47  ;;  %351 = vpow2.f32 %v184_v49  ;;  %vm543_vm10 = vmand %vm194_vm5, %vm200_vm6  ;;  %vm703_vm14 = vcmp.lt.f32.partialorder %v453_v16, 0  ;;  %v379_v53 = vmov 2139095040   ;;  %vm704_vm5 = vcmp.lt.f32.partialorder %v461_v19, 0  ;;  %s357_s26 = scalar_lea.vmem %s140_s25, 128  ;;  %p362_p1 = scmp.lt.s32.totalorder %s140_s25, %s140_s25 }
  0x22   :  { %vm552_vm12 = vmand %vm190_vm7, %vm255_vm8  ;;  %v222_v54 = vsel %vm190_vm7, 0, %v379_v53  ;;  %v380_v59 = vmov 0   ;;  %vm228_vm0 = vcmp.ne.f32.partialorder %v417_v4, %v417_v4  ;;  %p358_p0 = scmp.ne.s32.totalorder %s140_s25, %s357_s26  ;;  %p363_p2 = scmp.lt.s32.totalorder %s357_s26, %s357_s26 }
  0x23   :  { %vm560_vm15 = vmxor %vm190_vm7, %vm258_vm9  ;;  %v223_v58 = vxor.u32 2147483648, %v222_v54  ;;  %v210_v60 = vsel %vm190_vm7, 2139095040, %v380_v59 }
  0x24   :  { %vm571_vm1 = vmand %vm190_vm7, %vm203_vm11  ;;  %p364_p3 = por %p363_p2, %p362_p1 }
  0x25   :  { %vm577_vm3 = vmxor %vm190_vm7, %vm206_vm13  ;;  %vm188_vm13 = vcmp.eq.f32.partialorder %v417_v4, 0  ;;  %vm279_vm7 = vcmp.ne.f32.partialorder %v453_v16, %v453_v16  ;;  %v224_v1 = vsel %vm543_vm10, %v223_v58, %v222_v54 }
  0x26   :  { %vm585_vm4 = vmand %vm703_vm14, %vm519_vm2  ;;  %vm257_vm14 = vcmp.lt.s32.totalorder %v453_v16, 0  ;;  %p365_p4 = pnand %p364_p3, %p358_p0 }
  0x27   :  { %vm269_vm6 = vmor %vm552_vm12, %vm560_vm15  ;;  %vm271_vm15 = vcmp.eq.f32.partialorder %v453_v16, 3212836864 }
  0x28   :  { %vm217_vm9 = vmor %vm571_vm1, %vm577_vm3  ;;  %v270_v63 = vsel %vm269_vm6, 2139095040, %v380_v59  ;;  %vm205_vm1 = vcmp.lt.s32.totalorder %v461_v19, 0  ;;  %vm256_vm3 = vcmp.eq.f32.partialorder %v453_v16, 1065353216  ;;  %vm259_vm6 = vcmp.eq.f32.partialorder %v470_v22, 2139095040 }
  0x29   :  { %vm609_vm12 = vmand %vm704_vm5, %vm519_vm2  ;;  %v218_v3 = vsel %vm217_vm9, 2139095040, %v380_v59  ;;  %vm219_vm2 = vcmp.eq.f32.partialorder %v461_v19, 3212836864  ;;  %v272_v8 = vsel %vm271_vm15, 1065353216, %v270_v63  ;;  %vm227_vm9 = vcmp.ne.f32.partialorder %v461_v19, %v461_v19 }
  0x2a   :  { %vm264_vm5 = vmand %vm257_vm14, %vm543_vm10  ;;  %v220_v13 = vsel %vm219_vm2, 1065353216, %v218_v3  ;;  %vm724_vm15 = vcmp.lt.f32.partialorder %v461_v19, 0 }
  0x2b   :  { %vm648_vm14 = vmor %vm279_vm7, %vm228_vm0  ;;  %v225_v15 = vsel %vm724_vm15, %v224_v1, %v222_v54  ;;  %vm725_vm7 = vcmp.eq.f32.partialorder %v467_v21, 2139095040 }
  0x2c   :  { %v350_v62 = vpop.eup %349  ;;  %vm726_vm2 = vmmov %vm725_vm7 }
  0x2d   :  { %v261_v2 = vsel %vm585_vm4, 2143289344, %v350_v62  ;;  %vm212_vm4 = vmand %vm205_vm1, %vm543_vm10 }
  0x2e   :  { %v352_v0 = vpop.eup %351  ;;  %v263_v5 = vsel %vm255_vm8, %v210_v60, %v261_v2  ;;  %vm721_vm8 = vcmp.lt.f32.partialorder %v453_v16, 0  ;;  %vm283_vm10 = vmor %vm256_vm3, %vm188_vm13 }
  0x2f   :  { %v209_v6 = vsel %vm609_vm12, 2143289344, %v352_v0  ;;  %v265_v7 = vxor.u32 2147483648, %v263_v5  ;;  %v277_v10 = vsel %vm721_vm8, %v224_v1, %v222_v54  ;;  %vm207_vm12 = vcmp.eq.f32.partialorder %v476_v24, 2139095040  ;;  %vm229_vm1 = vmor %vm227_vm9, %vm228_vm0 }
  0x30   :  { %v211_v9 = vsel %vm203_vm11, %v210_v60, %v209_v6  ;;  %vm204_vm11 = vcmp.eq.f32.partialorder %v461_v19, 1065353216 }
  0x31   :  { %v213_v12 = vxor.u32 2147483648, %v211_v9  ;;  %v266_v14 = vsel %vm264_vm5, %v265_v7, %v263_v5  ;;  %vm189_vm5 = vcmp.eq.f32.partialorder %v417_v4, 1065353216  ;;  %vm231_vm3 = vmor %vm204_vm11, %vm188_vm13 }
  0x32   :  { %v273_v17 = vsel %vm725_vm7, %v272_v8, %v266_v14 }
  0x33   :  { %v214_v18 = vsel %vm212_vm4, %v213_v12, %v211_v9  ;;  %v278_v20 = vsel %vm259_vm6, %v277_v10, %v273_v17 }
  0x34   :  { %v221_v23 = vsel %vm726_vm2, %v220_v13, %v214_v18  ;;  %v282_v24 = vsel %vm648_vm14, 2143289344, %v278_v20 }
  0x35   :  { %v226_v25 = vsel %vm207_vm12, %v225_v15, %v221_v23  ;;  %v284_v26 = vsel %vm283_vm10, 1065353216, %v282_v24 }
  0x36   :  { %v230_v27 = vsel %vm229_vm1, 2143289344, %v226_v25  ;;  %v285_v28 = vsel %vm189_vm5, %v453_v16, %v284_v26 }
  0x37   :  { %v232_v29 = vsel %vm231_vm3, 1065353216, %v230_v27  ;;  %120 = vmatprep.mubr.f32.mxu0 %v285_v28 }
  0x38   :  { %v233_v30 = vsel %vm189_vm5, %v461_v19, %v232_v29 }
  0x39   :  { %121 = vmatmul.mubr.f32.vlgmr.msra.gmra.mxu0 %v233_v30 }
  0x41   :  { %s287_s2 = spop %286 }
  0x42   :  { %v129_v4 = vstv %s287_s2 }
  0x43   :  { %v292_v33 = vand.u32 2147483647, %v129_v4  ;;  %v297_v35 = vtrunc.f32 %v129_v4  ;;  %vm296_vm8 = vcmp.lt.f32.partialorder %v129_v4, 0 }
  0x44   :  { %v328_v39 = vsel %vm296_vm8, 0, %v379_v53  ;;  %v316_v43 = vsel %vm296_vm8, 2139095040, %v380_v59 }
  0x45   :  { %v301_v34 = vtrunc.f32 %v292_v33  ;;  %vm293_vm0 = vcmp.eq.f32.partialorder %v292_v33, 2139095040  ;;  %vm298_vm13 = vcmp.ne.f32.partialorder %v129_v4, %v297_v35  ;;  %vm300_vm11 = vcmp.lt.f32.partialorder %v292_v33, 1266679808 }
  0x46   :  { %vm677_vm6 = vmor %vm298_vm13, %vm293_vm0  ;;  %v329_v40 = vxor.u32 2147483648, %v328_v39 }
  0x47   :  { %v302_v36 = vcvt.f32.s32 %v301_v34  ;;  %vm305_vm9 = vmneg %vm677_vm6 }
  0x49   :  { %v303_v16 = vand.u32 1, %v302_v36 }
  0x4b   :  { %vm304_vm4 = vcmp.eq.s32.totalorder %v303_v16, 1 }
  0x4c   :  { %vm306_vm10 = vmand %vm304_vm4, %vm305_vm9 }
  0x4d   :  { %vm307_vm7 = vmand %vm300_vm11, %vm306_vm10  ;;  %vm334_vm11 = vcmp.ne.f32.partialorder %v129_v4, %v129_v4  ;;  %vm294_vm10 = vcmp.eq.f32.partialorder %v129_v4, 0 }
  0x4e   :  { %v330_v47 = vsel %vm307_vm7, %v329_v40, %v328_v39 }
  0xf9   :  { %v179_v22 = vpop.f32.mrf.mxu0 }
  0xfb   :  { %v180_v31 = vpop.f32.mrf.mxu0 }
  0xfc   :  { %v181_v21 = vadd.f32 %v180_v31, %v179_v22 }
  0xfe   :  { %v288_v32 = vand.u32 2147483647, %v181_v21  ;;  %vm309_vm12 = vcmp.eq.f32.partialorder %v181_v21, 0  ;;  %vm308_vm1 = vcmp.lt.f32.partialorder %v181_v21, 0  ;;  %vm311_vm13 = vcmp.lt.s32.totalorder %v181_v21, 0 }
  0xff   :  { %vm321_vm5 = vmand %vm296_vm8, %vm309_vm12  ;;  %vm325_vm9 = vcmp.eq.f32.partialorder %v181_v21, 3212836864  ;;  %v331_v51 = vsel %vm308_vm1, %v330_v47, %v328_v39 }
 0x100   :  { %353 = vlog2.f32 %v288_v32  ;;  %vm312_vm14 = vcmp.gt.f32.partialorder %v288_v32, 1065353216  ;;  %vm314_vm3 = vmand %vm308_vm1, %vm677_vm6 }
 0x101   :  { %vm322_vm15 = vmxor %vm296_vm8, %vm312_vm14  ;;  %vm333_vm14 = vcmp.ne.f32.partialorder %v181_v21, %v181_v21 }
 0x102   :  { %vm323_vm2 = vmor %vm321_vm5, %vm322_vm15  ;;  %vm310_vm15 = vcmp.eq.f32.partialorder %v181_v21, 1065353216  ;;  %vm313_vm5 = vcmp.eq.f32.partialorder %v288_v32, 2139095040 }
 0x103   :  { %v324_v45 = vsel %vm323_vm2, 2139095040, %v380_v59  ;;  %vm318_vm4 = vmand %vm311_vm13, %vm307_vm7  ;;  %vm295_vm7 = vcmp.eq.f32.partialorder %v129_v4, 1065353216 }
 0x104   :  { %v326_v49 = vsel %vm325_vm9, 1065353216, %v324_v45  ;;  %vm335_vm6 = vmor %vm333_vm14, %vm334_vm11 }
 0x105   :  { %vm337_vm8 = vmor %vm310_vm15, %vm294_vm10 }
 0x10d   :  { %v354_v37 = vpop.eup %353 }
 0x10e   :  { %v290_v38 = vmul.f32 %v354_v37, %v129_v4 }
 0x110   :  { %355 = vpow2.f32 %v290_v38 }
 0x11d   :  { %v356_v41 = vpop.eup %355 }
 0x11e   :  { %v315_v42 = vsel %vm314_vm3, 2143289344, %v356_v41 }
 0x11f   :  { %v317_v44 = vsel %vm309_vm12, %v316_v43, %v315_v42  ;;  %vm131_vm12 = vcmask 261120  }
 0x120   :  { %v319_v46 = vxor.u32 2147483648, %v317_v44 }
 0x122   :  { %v320_v48 = vsel %vm318_vm4, %v319_v46, %v317_v44 }
 0x123   :  { %v327_v50 = vsel %vm293_vm0, %v326_v49, %v320_v48 }
 0x124   :  { %v332_v52 = vsel %vm313_vm5, %v331_v51, %v327_v50 }
 0x125   :  { %v336_v53 = vsel %vm335_vm6, 2143289344, %v332_v52 }
 0x126   :  { %v338_v54 = vsel %vm337_vm8, 1065353216, %v336_v53 }
 0x127   :  { %v339_v55 = vsel %vm295_vm7, %v181_v21, %v338_v54 }
 0x128   :  { %132 = vst.msk [vmem:[#allocation3] sm:$0xff] %vm131_vm12, %v339_v55 }
 0x129   :  { %368 = shalt.err (!%p365_p4)
}
 0x12a   :  { %142 = dma.vmem_to_hbm [thread:$0]  %s140_s25, 128, %s701_s3, [#allocation4]  }
 0x12b   :  { %377 = dma.done.wait [#allocation4], 128  }
 0x12c   :  { %378 = vsyncadd [#allocation4], 4294967168 }
 0x12d   :  { %146 = vsyncpa [#allocation4], 1 }

</bundles_post_ra>
